<compile_context>
chip_gen: v7x
topology: tpu7x:2x2x1
jax: 0.10.0
libtpu: 0.0.40
codegen_flags: <defaults>
</compile_context>

<pallas_src>
import jax
import jax.numpy as jnp
from jax.experimental import pallas as pl
from jax.experimental.pallas import tpu as pltpu  # noqa: F401  (kept for TPU-specific tuning hooks)


def _identity_copy_kernel(x_ref, o_ref):
    # x_ref / o_ref: (B, L) lane-dense slabs -> pure unmasked copy.
    o_ref[...] = x_ref[...]


def patch_embedding(x: jax.Array, num_patches: int, patch_size: int) -> jax.Array:
    """x: [B, L, 1] with L == num_patches * patch_size -> [B, num_patches, patch_size]."""
    B, L, one = x.shape
    assert one == 1, "expected trailing singleton channel dim"
    assert L == num_patches * patch_size, (
        f"Input sequence length should be {num_patches * patch_size}"
    )

    # Free metadata reshape in the wrapper: present a lane-dense 2D slab to the kernel.
    x2d = x.reshape(B, L)
    itemsize = jnp.dtype(x.dtype).itemsize

    out2d = pl.pallas_call(
        _identity_copy_kernel,
        out_shape=jax.ShapeDtypeStruct((B, L), x.dtype),
        # No grid: one step covers the whole (tiny) array; block == full array,
        # so the (8,128) rule is satisfied by the full-dim exception and the
        # last dim (256) is a multiple of 128 -> unmasked full-lane stores.
        in_specs=[pl.BlockSpec((B, L), lambda: (0, 0))],
        out_specs=pl.BlockSpec((B, L), lambda: (0, 0)),
        # Identity copy: let XLA alias input and output buffers.
        input_output_aliases={0: 0},
        cost_estimate=pl.CostEstimate(
            flops=0, transcendentals=0, bytes_accessed=2 * B * L * itemsize
        ),
    )(x2d)

    # Free metadata reshape back to the module's output layout.
    return out2d.reshape(B, num_patches, patch_size)


if __name__ == "__main__":
    # Small shapes consistent with the module: batch=2, num_patches=8, patch_size=32.
    batch = 2
    num_patches = 8
    patch_size = 32
    seq_len = num_patches * patch_size  # 256 (lane-dense: 2 * 128)

    key = jax.random.PRNGKey(0)
    x = jax.random.normal(key, (batch, seq_len, 1), dtype=jnp.float32)

    # Reference semantics: pure reshape.
    ref = jnp.reshape(x, (batch, num_patches, patch_size))

    out = patch_embedding(x, num_patches, patch_size)
    out = jax.block_until_ready(out)

    assert out.shape == (batch, num_patches, patch_size)
    assert out.dtype == x.dtype
    assert bool(jnp.allclose(out, ref)), "mismatch vs. reference reshape"

    print("KERNEL_OK")
</pallas_src>

<mosaic_0001>
module attributes {stable_mosaic.version = 11 : i64} {
  func.func @_identity_copy_kernel(%arg0: memref<2x256xf32, #tpu.memory_space<vmem>>, %arg1: memref<2x256xf32, #tpu.memory_space<vmem>>) attributes {dimension_semantics = [], scalar_prefetch = 0 : i64, scratch_operands = 0 : i64, tpu.core_type = #tpu.core_type<tc>} {
    %c0 = arith.constant 0 : index
    %c0_0 = arith.constant 0 : index
    %0 = vector.load %arg0[%c0, %c0_0] : memref<2x256xf32, #tpu.memory_space<vmem>>, vector<2x256xf32>
    %c0_1 = arith.constant 0 : index
    %c0_2 = arith.constant 0 : index
    %1 = vector.load %arg1[%c0_1, %c0_2] : memref<2x256xf32, #tpu.memory_space<vmem>>, vector<2x256xf32>
    tpu.vector_store %arg1[%c0_1, %c0_2], %0 {strides = array<i32>} : memref<2x256xf32, #tpu.memory_space<vmem>>, vector<2x256xf32>,
    return
  }
}

</mosaic_0001>

<bundles_post_ra>
// kernel: tpu_custom_call.1
= control target key start
LH: loop header
LB: loop body
LE: loop exit
PB: predicated region body
PF: predicated region fallthrough
CT: control target
= control target key end

     0   :  { %6 = vsyncpa [#allocation3], 0  ;;  %s124_s0 = inlined_call_operand.hbm [shape: f32[2,256], index: 0, kind: input, shape index: {}, may-alias: {0,1}]   ;;  %s125_s1 = inlined_call_operand.hbm [shape: f32[2,256], index: 1, kind: output, shape index: {}, may-alias: {0,1}]  }
   0x1   :  { %7 = vsyncpa [#allocation4], 0  ;;  %s88_s6 = smov [#allocation2]   ;;  %s40_s10 = scalar_lea.hbm %s124_s0, 64 }
   0x2   :  { %s14_s7 = sshll.u32 %s88_s6, 4  ;;  %p41_p0 = scmp.ne.s32.totalorder %s124_s0, %s40_s10  ;;  %s15_s7 = int_to_ptr.vmem [resolvable:$true] %s14_s7 }
   0x3   :  { %p44_p1 = scmp.lt.u32.totalorder %s40_s10, %s124_s0 }
   0x5   :  { %p46_p2 = pnand %p44_p1, %p41_p0 }
   0x7   :  { %49 = shalt.err (!%p46_p2)
}
   0x8   :  { %s50_s15 = scalar_lea.vmem %s15_s7, 64  ;;  %p55_p4 = scmp.lt.s32.totalorder %s15_s7, %s15_s7 }
   0x9   :  { %p51_p3 = scmp.ne.s32.totalorder %s15_s7, %s50_s15  ;;  %p56_p5 = scmp.lt.s32.totalorder %s50_s15, %s50_s15 }
   0xb   :  { %p57_p6 = por %p56_p5, %p55_p4 }
   0xd   :  { %p58_p7 = pnand %p57_p6, %p51_p3 }
   0xf   :  { %61 = shalt.err (!%p58_p7)
}
  0x10   :  { %17 = dma.hbm_to_vmem [thread:$0]  %s124_s0, 64, %s15_s7, [#allocation3]  }
  0x11   :  { %84 = dma.done.wait [#allocation3], 64  }
  0x12   :  { %85 = vsyncadd [#allocation3], 4294967232  ;;  %s89_s18 = smov [#allocation5]   ;;  %v21_v0 = vld [vmem:[#allocation2] sm:$0xf] }
  0x13   :  { %s29_s19 = sshll.u32 %s89_s18, 4  ;;  %22 = vst [vmem:[#allocation5] sm:$0xf] %v21_v0  ;;  %s30_s19 = int_to_ptr.vmem [resolvable:$true] %s29_s19 }
  0x14   :  { %s62_s20 = scalar_lea.vmem %s30_s19, 64  ;;  %p67_p9 = scmp.lt.s32.totalorder %s30_s19, %s30_s19 }
  0x15   :  { %p63_p8 = scmp.ne.s32.totalorder %s30_s19, %s62_s20  ;;  %p68_p10 = scmp.lt.s32.totalorder %s62_s20, %s62_s20 }
  0x17   :  { %p69_p11 = por %p68_p10, %p67_p9 }
  0x19   :  { %p70_p12 = pnand %p69_p11, %p63_p8 }
  0x1b   :  { %73 = shalt.err (!%p70_p12)
}
  0x1c   :  { %s74_s23 = scalar_lea.hbm %s125_s1, 64 }
  0x1d   :  { %p75_p13 = scmp.ne.s32.totalorder %s125_s1, %s74_s23  ;;  %p78_p0 = scmp.lt.u32.totalorder %s74_s23, %s125_s1 }
  0x1f   :  { %p80_p1 = pnand %p78_p0, %p75_p13 }
  0x21   :  { %83 = shalt.err (!%p80_p1)
}
  0x22   :  { %32 = dma.vmem_to_hbm [thread:$0]  %s30_s19, 64, %s125_s1, [#allocation4]  }
  0x23   :  { %86 = dma.done.wait [#allocation4], 64  }
  0x24   :  { %87 = vsyncadd [#allocation4], 4294967232 }
  0x25   :  { %36 = vsyncpa [#allocation3], 1 }
  0x26   :  { %37 = vsyncpa [#allocation4], 1 }

</bundles_post_ra>
